<compile_context>
chip_gen: v6e
topology: v6e:2x2x1
jax: 0.10.0
libtpu: 0.0.40
codegen_flags: <defaults>
</compile_context>

<pallas_src>
import jax
import jax.numpy as jnp
from jax.experimental import pallas as pl
from jax.experimental.pallas import tpu as pltpu


def _swish_kernel(beta_ref, x_ref, o_ref):
    # beta is a (1,1) scalar in SMEM; ReLU it in-kernel (beta_normalization).
    beta = jnp.maximum(beta_ref[0, 0], jnp.float32(0.0))
    x = x_ref[...].astype(jnp.float32)
    z = beta * x
    # sigmoid(z) = 0.5 * (1 + tanh(z/2)): one EUP op, tanh saturates (no inf/NaN
    # even in masked ragged lanes), compute stays hidden under the HBM stream.
    y = x * (0.5 * (1.0 + jnp.tanh(0.5 * z)))
    o_ref[...] = y.astype(o_ref.dtype)


def _compiler_params():
    return pltpu.CompilerParams(
        dimension_semantics=("parallel",),
        # Comfortable for triple-buffered in + double-buffered out tiles and
        # <= physical VMEM on v5e / v6e (128 MiB) and v7x (64 MiB).
        vmem_limit_bytes=32 * 1024 * 1024,
    )


def _pick_block_rows(M: int, min_rows: int, lanes: int, itemsize: int,
                     target_bytes: int = 2 * 1024 * 1024) -> int:
    """Rows per tile: ~2 MiB of payload per block (amortizes the ~0.35 us
    per-grid-step overhead), rounded to the dtype's sublane tile, but capped
    so the grid keeps >= ~8 steps (each v7x TensorCore then gets >= 4)."""
    if M <= min_rows:
        return M                                   # full-extent block (allowed)
    rows_bytes = max(min_rows,
                     (target_bytes // (lanes * itemsize)) // min_rows * min_rows)
    rows_grid = pl.cdiv(pl.cdiv(M, 8), min_rows) * min_rows
    return max(min_rows, min(rows_bytes, rows_grid))


def _swish_2d(beta2, flat, n, orig_dtype):
    """Main path: numel is a multiple of 128 -> lane-dense (M, lanes) slab."""
    lanes = 512 if n % 512 == 0 else 128
    x2 = flat.reshape(-1, lanes)
    M = x2.shape[0]

    itemsize = jnp.dtype(orig_dtype).itemsize
    min_rows = 8 * max(1, 4 // max(1, itemsize))   # 8 f32 / 16 bf16 / 32 int8
    tm = _pick_block_rows(M, min_rows, lanes, itemsize)
    steps = pl.cdiv(M, tm)                         # ragged last block is masked

    x_spec = pl.BlockSpec((tm, lanes), lambda i: (i, 0))
    if steps > 2:
        # Deeper input pipeline hides DMA issue latency between short steps
        # (mainly a v7x win with its 3.2 TB/s HBM; costs one extra tile of VMEM).
        x_spec = pl.BlockSpec((tm, lanes), lambda i: (i, 0),
                              pipeline_mode=pl.Buffered(3))

    out = pl.pallas_call(
        _swish_kernel,
        out_shape=jax.ShapeDtypeStruct((M, lanes), orig_dtype),
        grid=(steps,),
        in_specs=[
            pl.BlockSpec(memory_space=pltpu.MemorySpace.SMEM),   # beta (1,1)
            x_spec,
        ],
        out_specs=pl.BlockSpec((tm, lanes), lambda i: (i, 0)),
        compiler_params=_compiler_params(),
    )(beta2, x2)
    return out.reshape(-1)


def _swish_ragged(beta2, flat, n, orig_dtype):
    """Fallback: numel % 128 != 0.  Single-row (1, n) lane-major layout with a
    cdiv grid; Pallas masks the ragged tail of the last lane block, so there is
    no pad/slice HBM round-trip.  The lone row uses 1/8 of each vreg's
    sublanes, but this path keeps a single HBM pass and only triggers for
    odd-sized tensors."""
    x2 = flat.reshape(1, n)
    MAX_SINGLE = 32 * 1024                          # elems; ~1 MiB VMEM / block
    if n <= MAX_SINGLE:
        tb = n                                      # full-extent block (allowed)
    else:
        # lane-tile granularity (128); keep >= ~8 grid steps for megacore.
        tb = min(MAX_SINGLE, pl.cdiv(pl.cdiv(n, 8), 128) * 128)
    steps = pl.cdiv(n, tb)

    out = pl.pallas_call(
        _swish_kernel,
        out_shape=jax.ShapeDtypeStruct((1, n), orig_dtype),
        grid=(steps,),
        in_specs=[
            pl.BlockSpec(memory_space=pltpu.MemorySpace.SMEM),   # beta (1,1)
            pl.BlockSpec((1, tb), lambda i: (0, i)),
        ],
        out_specs=pl.BlockSpec((1, tb), lambda i: (0, i)),
        compiler_params=_compiler_params(),
    )(beta2, x2)
    return out.reshape(-1)


def swish(x: jax.Array, beta: jax.Array) -> jax.Array:
    """Elementwise Swish with learnable scalar beta (matches the PyTorch module).

    Forward only; autograd of beta is handled by JAX outside the kernel.
    """
    orig_shape = x.shape
    orig_dtype = x.dtype

    flat = x.reshape(-1)        # contiguous reshape: free in XLA
    n = flat.shape[0]
    beta2 = jnp.asarray(beta, jnp.float32).reshape(1, 1)

    if n % 128 == 0:
        out_flat = _swish_2d(beta2, flat, n, orig_dtype)
    else:
        out_flat = _swish_ragged(beta2, flat, n, orig_dtype)
    return out_flat.reshape(orig_shape)


if __name__ == "__main__":
    key = jax.random.PRNGKey(0)
    # Deterministic parameter init, exactly as the module's __init__: beta = 1.0
    beta = jnp.array(1.0, dtype=jnp.float32)

    def ref(x):
        return jax.nn.sigmoid(jnp.maximum(beta, 0.0) * x) * x

    # 1) module-sized NCHW input: batch=2, channels=4, spatial=16x16
    x1 = jax.random.normal(key, (2, 4, 16, 16), dtype=jnp.float32)
    y1 = jax.block_until_ready(swish(x1, beta))
    assert y1.shape == x1.shape and y1.dtype == x1.dtype
    assert jnp.allclose(y1, ref(x1), atol=1e-3, rtol=1e-3)

    # 2) multi-step grid: exercises the pipelined / Buffered(3) path
    x2 = jax.random.normal(jax.random.PRNGKey(1), (8, 8, 32, 32), dtype=jnp.float32)
    y2 = jax.block_until_ready(swish(x2, beta))
    assert jnp.allclose(y2, ref(x2), atol=1e-3, rtol=1e-3)

    # 3) ragged row count: masked last row-block, no pad
    x3 = jax.random.normal(jax.random.PRNGKey(2), (4, 5, 16, 16), dtype=jnp.float32)
    y3 = jax.block_until_ready(swish(x3, beta))
    assert jnp.allclose(y3, ref(x3), atol=1e-3, rtol=1e-3)

    # 4) numel not a multiple of 128: no-pad single-row fallback
    x4 = jax.random.normal(jax.random.PRNGKey(3), (3, 5, 7), dtype=jnp.float32)
    y4 = jax.block_until_ready(swish(x4, beta))
    assert jnp.allclose(y4, ref(x4), atol=1e-3, rtol=1e-3)

    print("KERNEL_OK")
</pallas_src>

<mosaic_0001>
module attributes {stable_mosaic.version = 11 : i64} {
  func.func @_swish_kernel(%arg0: i32, %arg1: memref<1x1xf32, #tpu.memory_space<smem>>, %arg2: memref<4x512xf32, #tpu.memory_space<vmem>>, %arg3: memref<4x512xf32, #tpu.memory_space<vmem>>) attributes {dimension_semantics = [#tpu.dimension_semantics<parallel>], iteration_bounds = array<i64: 1>, scalar_prefetch = 0 : i64, scratch_operands = 0 : i64, tpu.core_type = #tpu.core_type<tc>, window_params = [{transform_indices = @transform_0, window_bounds = array<i64: 1, 1>}, {transform_indices = @transform_1, window_bounds = array<i64: 4, 512>}, {transform_indices = @transform_2, window_bounds = array<i64: 4, 512>}]} {
    %c0 = arith.constant 0 : index
    %c0_0 = arith.constant 0 : index
    %0 = memref.load %arg1[%c0, %c0_0] : memref<1x1xf32, #tpu.memory_space<smem>>
    %cst = arith.constant 0.000000e+00 : f32
    %1 = arith.maximumf %0, %cst : f32
    %c0_1 = arith.constant 0 : index
    %c0_2 = arith.constant 0 : index
    %2 = vector.load %arg2[%c0_1, %c0_2] : memref<4x512xf32, #tpu.memory_space<vmem>>, vector<4x512xf32>
    %3 = vector.broadcast %1 : f32 to vector<4x512xf32>
    %4 = arith.mulf %3, %2 : vector<4x512xf32>
    %cst_3 = arith.constant 5.000000e-01 : f32
    %5 = vector.broadcast %cst_3 : f32 to vector<4x512xf32>
    %6 = arith.mulf %5, %4 : vector<4x512xf32>
    %7 = math.tanh %6 : vector<4x512xf32>
    %cst_4 = arith.constant 1.000000e+00 : f32
    %8 = vector.broadcast %cst_4 : f32 to vector<4x512xf32>
    %9 = arith.addf %8, %7 : vector<4x512xf32>
    %cst_5 = arith.constant 5.000000e-01 : f32
    %10 = vector.broadcast %cst_5 : f32 to vector<4x512xf32>
    %11 = arith.mulf %10, %9 : vector<4x512xf32>
    %12 = arith.mulf %2, %11 : vector<4x512xf32>
    %c0_6 = arith.constant 0 : index
    %c0_7 = arith.constant 0 : index
    %13 = vector.load %arg3[%c0_6, %c0_7] : memref<4x512xf32, #tpu.memory_space<vmem>>, vector<4x512xf32>
    tpu.vector_store %arg3[%c0_6, %c0_7], %12 {strides = array<i32>} : memref<4x512xf32, #tpu.memory_space<vmem>>, vector<4x512xf32>,
    return
  }
  func.func @transform_0(%arg0: i32) -> (i32, i32) {
    %c0_i32 = arith.constant 0 : i32
    %c0_i32_0 = arith.constant 0 : i32
    %c0_i32_1 = arith.constant 0 : i32
    return %c0_i32, %c0_i32_0 : i32, i32
  }
  func.func @transform_1(%arg0: i32) -> (i32, i32) {
    %c0_i32 = arith.constant 0 : i32
    %c0_i32_0 = arith.constant 0 : i32
    return %arg0, %c0_i32 : i32, i32
  }
  func.func @transform_2(%arg0: i32) -> (i32, i32) {
    %c0_i32 = arith.constant 0 : i32
    %c0_i32_0 = arith.constant 0 : i32
    return %arg0, %c0_i32 : i32, i32
  }
}

</mosaic_0001>

<bundles_post_ra>
// kernel: tpu_custom_call.1
= control target key start
LH: loop header
LB: loop body
LE: loop exit
PB: predicated region body
PF: predicated region fallthrough
CT: control target
= control target key end

     0   :  { %8 = vsyncpa [#allocation4], 0  ;;  %s137_s0 = inlined_call_operand.<no memory space> [shape: f32[1,1], index: 0, kind: input, shape index: {}]   ;;  %s138_s1 = inlined_call_operand.hbm [shape: f32[4,512], index: 1, kind: input, shape index: {}]   ;;  %s139_s2 = inlined_call_operand.hbm [shape: f32[4,512], index: 2, kind: output, shape index: {}]  }
   0x1   :  { %9 = vsyncpa [#allocation5], 0  ;;  %s110_s9 = smov [#allocation3]  }
   0x2   :  { %s18_s10 = sshll.u32 %s110_s9, 4  ;;  %s19_s10 = int_to_ptr.vmem [resolvable:$true] %s18_s10 }
   0x3   :  { %s74_s11 = scalar_lea.vmem %s19_s10, 256  ;;  %p79_p1 = scmp.lt.s32.totalorder %s19_s10, %s19_s10 }
   0x4   :  { %p75_p0 = scmp.ne.s32.totalorder %s19_s10, %s74_s11  ;;  %p80_p2 = scmp.lt.s32.totalorder %s74_s11, %s74_s11 }
   0x6   :  { %p81_p3 = por %p80_p2, %p79_p1 }
   0x8   :  { %p82_p4 = pnand %p81_p3, %p75_p0 }
   0xa   :  { %85 = shalt.err (!%p82_p4)
}
   0xb   :  { %21 = dma.hbm_to_vmem [thread:$0]  %s138_s1, 256, %s19_s10, [#allocation4]  }
   0xc   :  { %106 = dma.done.wait [#allocation4], 256  }
   0xd   :  { %107 = vsyncadd [#allocation4], 4294967040  ;;  %s111_s14 = smov 0.0   ;;  %v27_v1 = vld [vmem:[#allocation3] sm:$0xff]  ;;  %v28_v2 = vld [vmem:[#allocation3 + $0x8] sm:$0xff]  ;;  %s112_s1 = smov [#allocation6]  }
   0xe   :  { %s26_s17 = smax.f32 %s111_s14, %s137_s0  ;;  %s50_s18 = sshll.u32 %s112_s1, 4  ;;  %s51_s18 = int_to_ptr.vmem [resolvable:$true] %s50_s18 }
   0xf   :  { %v29_v0 = vstv %s26_s17  ;;  %s86_s0 = scalar_lea.vmem %s51_s18, 256  ;;  %p91_p6 = scmp.lt.s32.totalorder %s51_s18, %s51_s18 }
  0x10   :  { %v30_v3 = vmul.f32 %v29_v0, %v27_v1  ;;  %v31_v4 = vmul.f32 %v29_v0, %v28_v2  ;;  %p87_p5 = scmp.ne.s32.totalorder %s51_s18, %s86_s0  ;;  %p92_p7 = scmp.lt.s32.totalorder %s86_s0, %s86_s0 }
  0x12   :  { %v32_v5 = vmul.f32 0.5, %v30_v3  ;;  %v33_v6 = vmul.f32 0.5, %v31_v4  ;;  %p93_p8 = por %p92_p7, %p91_p6 }
  0x14   :  { %62 = vtanh.f32 %v32_v5  ;;  %p94_p9 = pnand %p93_p8, %p87_p5 }
  0x15   :  { %64 = vtanh.f32 %v33_v6 }
  0x21   :  { %v63_v7 = vpop.eup %62 }
  0x22   :  { %v65_v8 = vpop.eup %64  ;;  %v36_v9 = vadd.f32 1.0, %v63_v7 }
  0x23   :  { %v37_v10 = vadd.f32 1.0, %v65_v8 }
  0x24   :  { %v38_v11 = vmul.f32 0.5, %v36_v9 }
  0x25   :  { %v39_v12 = vmul.f32 0.5, %v37_v10 }
  0x26   :  { %v40_v13 = vmul.f32 %v38_v11, %v27_v1 }
  0x27   :  { %v41_v14 = vmul.f32 %v39_v12, %v28_v2 }
  0x28   :  { %42 = vst [vmem:[#allocation6] sm:$0xff] %v40_v13 }
  0x29   :  { %43 = vst [vmem:[#allocation6 + $0x8] sm:$0xff] %v41_v14 }
  0x2a   :  { %97 = shalt.err (!%p94_p9)
}
  0x2b   :  { %53 = dma.vmem_to_hbm [thread:$0]  %s51_s18, 256, %s139_s2, [#allocation5]  }
  0x2c   :  { %108 = dma.done.wait [#allocation5], 256  }
  0x2d   :  { %109 = vsyncadd [#allocation5], 4294967040 }
  0x2e   :  { %57 = vsyncpa [#allocation4], 1 }
  0x2f   :  { %58 = vsyncpa [#allocation5], 1 }

</bundles_post_ra>
